<compile_context>
chip_gen: v7x
topology: tpu7x:2x2x1
jax: 0.10.0
libtpu: 0.0.40
codegen_flags: <defaults>
</compile_context>

<pallas_src>
import functools

import jax
import jax.numpy as jnp
from jax import lax
from jax.experimental import pallas as pl
from jax.experimental.pallas import tpu as pltpu

EPS = 1e-5
VMEM_LIMIT = 32 * 1024 * 1024          # raised past v5e's 16 MiB scoped default
_TILE_CANDIDATES = (4096, 2048, 1024, 512, 256, 128, 64, 32, 16, 8)


def _choose_tile_m(M, row_bytes, budget=8 * 1024 * 1024):
    """Largest row tile dividing M that fits a VMEM budget (x2 for double buffering)."""
    # TODO(synk): masked tail tiles for M not a multiple of 8.
    assert M % 8 == 0, f"row count {M} must be a multiple of 8"
    for t in _TILE_CANDIDATES:
        if M % t == 0 and t * row_bytes * 2 <= budget:
            return t
    return 8


def _mosaic_params(semantics):
    return pltpu.CompilerParams(dimension_semantics=semantics,
                                vmem_limit_bytes=VMEM_LIMIT)


# ----------------------------- Pallas kernels ------------------------------

def _bn_stats_kernel(x_ref, sum_ref, sq_ref):
    """Per-channel sum / sum-of-squares, accumulated across the row-tile grid axis."""
    @pl.when(pl.program_id(0) == 0)
    def _():
        sum_ref[...] = jnp.zeros_like(sum_ref)
        sq_ref[...] = jnp.zeros_like(sq_ref)
    x = x_ref[...].astype(jnp.float32)
    sum_ref[...] += jnp.sum(x, axis=0, keepdims=True)
    sq_ref[...] += jnp.sum(x * x, axis=0, keepdims=True)


def bn_batch_stats(x2d):
    """Raw per-channel sum and sum-of-squares over rows of a (M, C) array."""
    M, C = x2d.shape
    tm = _choose_tile_m(M, C * 4)
    # TODO(synk): on v7x, split this reduction across the 2 TensorCores (per-core partials).
    return pl.pallas_call(
        _bn_stats_kernel,
        out_shape=(jax.ShapeDtypeStruct((1, C), jnp.float32),
                   jax.ShapeDtypeStruct((1, C), jnp.float32)),
        grid=(M // tm,),
        in_specs=[pl.BlockSpec((tm, C), lambda i: (i, 0))],
        out_specs=(pl.BlockSpec((1, C), lambda i: (0, 0)),
                   pl.BlockSpec((1, C), lambda i: (0, 0))),
        compiler_params=_mosaic_params(("arbitrary",)),
    )(x2d)


def _bn_relu_mm_stats_kernel(x_ref, sc_ref, sh_ref, w_ref,
                             o_ref, sum_ref, sq_ref, *, mxu_dtype):
    """o = relu(x*scale+shift) @ w, plus fused per-channel sum / sumsq of o."""
    @pl.when(pl.program_id(0) == 0)
    def _():
        sum_ref[...] = jnp.zeros_like(sum_ref)
        sq_ref[...] = jnp.zeros_like(sq_ref)
    a = jnp.maximum(x_ref[...].astype(jnp.float32) * sc_ref[...] + sh_ref[...], 0.0)
    y = jnp.dot(a.astype(mxu_dtype), w_ref[...], preferred_element_type=jnp.float32)
    o_ref[...] = y.astype(o_ref.dtype)
    sum_ref[...] += jnp.sum(y, axis=0, keepdims=True)
    sq_ref[...] += jnp.sum(y * y, axis=0, keepdims=True)


def bn_relu_mm_stats(x2d, scale, shift, w, mxu_dtype, act_dtype):
    M, K = x2d.shape
    Nc = w.shape[1]
    tm = _choose_tile_m(M, (K + Nc) * 4)
    # TODO(synk): for large channel counts on v7x add a K/N grid axis instead of keeping
    #             the whole weight resident (64 MiB physical VMEM).
    return pl.pallas_call(
        functools.partial(_bn_relu_mm_stats_kernel, mxu_dtype=mxu_dtype),
        out_shape=(jax.ShapeDtypeStruct((M, Nc), act_dtype),
                   jax.ShapeDtypeStruct((1, Nc), jnp.float32),
                   jax.ShapeDtypeStruct((1, Nc), jnp.float32)),
        grid=(M // tm,),
        in_specs=[pl.BlockSpec((tm, K), lambda i: (i, 0)),
                  pl.BlockSpec((1, K), lambda i: (0, 0)),
                  pl.BlockSpec((1, K), lambda i: (0, 0)),
                  pl.BlockSpec((K, Nc), lambda i: (0, 0))],
        out_specs=(pl.BlockSpec((tm, Nc), lambda i: (i, 0)),
                   pl.BlockSpec((1, Nc), lambda i: (0, 0)),
                   pl.BlockSpec((1, Nc), lambda i: (0, 0))),
        compiler_params=_mosaic_params(("arbitrary",)),
    )(x2d, scale, shift, w)


def _conv3x3_kernel(x_ref, sc_ref, sh_ref, w_ref, mask_ref, *rest,
                    H, W, stride, pad, mxu_dtype):
    """Per-image fused kernel: a = relu(bn2(x)); 3x3 conv (stride, pad=1) as 9
    constant flat-row-shift matmuls over a zero-padded VMEM copy of `a`.  Vertical
    out-of-image taps land in the (persistently zero) halo rows for free; only the
    left/right column-edge taps need a 0/1 mask.  Strided output rows are picked with
    a small 0/1 selection matmul; bn3 stats are accumulated."""
    if stride > 1:
        sel_ref, o_ref, sum_ref, sq_ref, apad_ref = rest
    else:
        o_ref, sum_ref, sq_ref, apad_ref = rest

    @pl.when(pl.program_id(0) == 0)
    def _():
        sum_ref[...] = jnp.zeros_like(sum_ref)
        sq_ref[...] = jnp.zeros_like(sq_ref)
        # Scratch persists across the (sequential) batch grid: zero the halo once;
        # the interior [pad, pad+HW) is fully overwritten below on every step.
        apad_ref[...] = jnp.zeros(apad_ref.shape, apad_ref.dtype)

    HW = H * W
    cout = w_ref.shape[-1]
    a = jnp.maximum(x_ref[...].astype(jnp.float32) * sc_ref[...] + sh_ref[...], 0.0)
    apad_ref[pad:pad + HW, :] = a

    acc = jnp.zeros((HW, cout), jnp.float32)
    for kh in range(3):
        for kw in range(3):
            delta = (kh - 1) * W + (kw - 1)
            if kh == 1 and kw == 1:          # center tap: no shift, no mask
                a_k = a
            else:
                a_k = apad_ref[pad + delta:pad + delta + HW, :]
                if kw == 0:                  # needs left-column mask (row wrap)
                    a_k = a_k * mask_ref[0]
                elif kw == 2:                # needs right-column mask (row wrap)
                    a_k = a_k * mask_ref[1]
            acc = acc + jnp.dot(a_k.astype(mxu_dtype), w_ref[kh * 3 + kw],
                                preferred_element_type=jnp.float32)

    if stride > 1:
        y = jnp.dot(sel_ref[...], acc, preferred_element_type=jnp.float32)
    else:
        y = acc
    o_ref[...] = y.astype(o_ref.dtype)
    sum_ref[...] += jnp.sum(y, axis=0, keepdims=True)
    sq_ref[...] += jnp.sum(y * y, axis=0, keepdims=True)


def _conv3_col_masks(H, W):
    """Left/right column validity masks: vertical OOB taps are handled by the zero halo."""
    w = jnp.arange(H * W) % W
    left = (w >= 1).astype(jnp.float32).reshape(H * W, 1)      # for kw == 0 taps
    right = (w <= W - 2).astype(jnp.float32).reshape(H * W, 1)  # for kw == 2 taps
    return jnp.stack([left, right], axis=0)                     # (2, H*W, 1)


def _stride_select_matrix(H, W, stride):
    Ho, Wo = H // stride, W // stride
    p = jnp.arange(Ho * Wo)
    q = (p // Wo) * stride * W + (p % Wo) * stride
    return (q[:, None] == jnp.arange(H * W)[None, :]).astype(jnp.float32)


def conv3x3_bn_relu_stats(x2d, scale, shift, w9, batch, H, W, stride,
                          mxu_dtype, act_dtype):
    HW = H * W
    Cp = x2d.shape[1]
    cout = w9.shape[-1]
    Ho, Wo = H // stride, W // stride
    Mo = Ho * Wo
    pad = -(-(W + 1) // 8) * 8              # halo rows, rounded up for aligned stores

    in_specs = [pl.BlockSpec((HW, Cp), lambda n: (n, 0)),
                pl.BlockSpec((1, Cp), lambda n: (0, 0)),
                pl.BlockSpec((1, Cp), lambda n: (0, 0)),
                pl.BlockSpec((9, Cp, cout), lambda n: (0, 0, 0)),
                pl.BlockSpec((2, HW, 1), lambda n: (0, 0, 0))]
    args = [x2d, scale, shift, w9, _conv3_col_masks(H, W)]
    if stride > 1:
        in_specs.append(pl.BlockSpec((Mo, HW), lambda n: (0, 0)))
        args.append(_stride_select_matrix(H, W, stride))

    # TODO(synk): for large feature maps / channel counts, tile H (and K on v7x)
    #             instead of holding one whole image + all 9 weight taps in VMEM.
    return pl.pallas_call(
        functools.partial(_conv3x3_kernel, H=H, W=W, stride=stride, pad=pad,
                          mxu_dtype=mxu_dtype),
        out_shape=(jax.ShapeDtypeStruct((batch * Mo, cout), act_dtype),
                   jax.ShapeDtypeStruct((1, cout), jnp.float32),
                   jax.ShapeDtypeStruct((1, cout), jnp.float32)),
        grid=(batch,),
        in_specs=in_specs,
        out_specs=(pl.BlockSpec((Mo, cout), lambda n: (n, 0)),
                   pl.BlockSpec((1, cout), lambda n: (0, 0)),
                   pl.BlockSpec((1, cout), lambda n: (0, 0))),
        scratch_shapes=[pltpu.VMEM((HW + 2 * pad, Cp), jnp.float32)],
        compiler_params=_mosaic_params(("arbitrary",)),
    )(*args)


def _bn_relu_mm_add_proj_kernel(x_ref, sc_ref, sh_ref, w_ref,
                                xs_ref, scs_ref, shs_ref, ws_ref, o_ref, *, mxu_dtype):
    """o = relu(bn3(x)) @ w3 + relu(bn1(xs)) @ w_shortcut  (projection shortcut)."""
    a = jnp.maximum(x_ref[...].astype(jnp.float32) * sc_ref[...] + sh_ref[...], 0.0)
    b = jnp.maximum(xs_ref[...].astype(jnp.float32) * scs_ref[...] + shs_ref[...], 0.0)
    o_ref[...] = (jnp.dot(a.astype(mxu_dtype), w_ref[...], preferred_element_type=jnp.float32)
                  + jnp.dot(b.astype(mxu_dtype), ws_ref[...], preferred_element_type=jnp.float32))


def bn_relu_mm_add_proj(x2d, scale, shift, w, xs2d, scale_s, shift_s, ws, mxu_dtype):
    M, K = x2d.shape
    Ks = xs2d.shape[1]
    Nc = w.shape[1]
    tm = _choose_tile_m(M, (K + Ks + Nc) * 4)
    return pl.pallas_call(
        functools.partial(_bn_relu_mm_add_proj_kernel, mxu_dtype=mxu_dtype),
        out_shape=jax.ShapeDtypeStruct((M, Nc), jnp.float32),
        grid=(M // tm,),
        in_specs=[pl.BlockSpec((tm, K), lambda i: (i, 0)),
                  pl.BlockSpec((1, K), lambda i: (0, 0)),
                  pl.BlockSpec((1, K), lambda i: (0, 0)),
                  pl.BlockSpec((K, Nc), lambda i: (0, 0)),
                  pl.BlockSpec((tm, Ks), lambda i: (i, 0)),
                  pl.BlockSpec((1, Ks), lambda i: (0, 0)),
                  pl.BlockSpec((1, Ks), lambda i: (0, 0)),
                  pl.BlockSpec((Ks, Nc), lambda i: (0, 0))],
        out_specs=pl.BlockSpec((tm, Nc), lambda i: (i, 0)),
        compiler_params=_mosaic_params(("parallel",)),
    )(x2d, scale, shift, w, xs2d, scale_s, shift_s, ws)


def _bn_relu_mm_add_id_kernel(x_ref, sc_ref, sh_ref, w_ref, r_ref, o_ref, *, mxu_dtype):
    """o = relu(bn3(x)) @ w3 + residual  (identity shortcut)."""
    a = jnp.maximum(x_ref[...].astype(jnp.float32) * sc_ref[...] + sh_ref[...], 0.0)
    o_ref[...] = (jnp.dot(a.astype(mxu_dtype), w_ref[...], preferred_element_type=jnp.float32)
                  + r_ref[...].astype(jnp.float32))


def bn_relu_mm_add_id(x2d, scale, shift, w, resid, mxu_dtype):
    M, K = x2d.shape
    Nc = w.shape[1]
    tm = _choose_tile_m(M, (K + 2 * Nc) * 4)
    return pl.pallas_call(
        functools.partial(_bn_relu_mm_add_id_kernel, mxu_dtype=mxu_dtype),
        out_shape=jax.ShapeDtypeStruct((M, Nc), jnp.float32),
        grid=(M // tm,),
        in_specs=[pl.BlockSpec((tm, K), lambda i: (i, 0)),
                  pl.BlockSpec((1, K), lambda i: (0, 0)),
                  pl.BlockSpec((1, K), lambda i: (0, 0)),
                  pl.BlockSpec((K, Nc), lambda i: (0, 0)),
                  pl.BlockSpec((tm, Nc), lambda i: (i, 0))],
        out_specs=pl.BlockSpec((tm, Nc), lambda i: (i, 0)),
        compiler_params=_mosaic_params(("parallel",)),
    )(x2d, scale, shift, w, resid)


# ------------------------------ glue (JAX) ---------------------------------

def _fold_bn(gamma, beta, s, q, count):
    """Fold batch stats (raw sum / sum-of-squares) + affine into per-channel scale/shift."""
    mean = s / count
    # NOTE: E[x^2]-mean^2 can cancel for large means; clamp at 0.  A two-pass / Welford
    # formulation would cost an extra HBM pass over the activation.
    var = jnp.maximum(q / count - mean * mean, 0.0)
    scale = gamma.reshape(1, -1).astype(jnp.float32) * lax.rsqrt(var + EPS)
    shift = beta.reshape(1, -1).astype(jnp.float32) - mean * scale
    return scale, shift


def preact_bottleneck_forward(x_nhwc, params, stride,
                              mxu_dtype=jnp.float32, act_dtype=None):
    """act_dtype: storage dtype of intermediate activations (defaults to mxu_dtype);
    BN statistics and all elementwise math stay float32."""
    act_dtype = mxu_dtype if act_dtype is None else act_dtype
    N, H, W, Cin = x_nhwc.shape
    planes = params["conv1_w"].shape[-1]
    Cout = params["conv3_w"].shape[-1]
    assert H % stride == 0 and W % stride == 0
    Ho, Wo = H // stride, W // stride
    M0, M2 = N * H * W, N * Ho * Wo
    assert (H * W) % 8 == 0 and (Ho * Wo) % 8 == 0, "per-image row count must be a multiple of 8"

    x2d = x_nhwc.reshape(M0, Cin)

    # ---- bn1 batch statistics (the only unavoidable extra pass over x) ----
    s1, q1 = bn_batch_stats(x2d)
    scale1, shift1 = _fold_bn(params["bn1_gamma"], params["bn1_beta"], s1, q1, M0)

    # ---- stage 1: out1 = relu(bn1(x)) @ conv1_w   (+ fused bn2 stats) ----
    w1 = params["conv1_w"].astype(mxu_dtype)
    out1, s2, q2 = bn_relu_mm_stats(x2d, scale1, shift1, w1, mxu_dtype, act_dtype)
    scale2, shift2 = _fold_bn(params["bn2_gamma"], params["bn2_beta"], s2, q2, M0)

    # ---- stage 2: out2 = conv3x3_stride(relu(bn2(out1)))   (+ fused bn3 stats) ----
    w2 = params["conv2_w"].reshape(9, planes, planes).astype(mxu_dtype)
    out2, s3, q3 = conv3x3_bn_relu_stats(out1, scale2, shift2, w2,
                                         N, H, W, stride, mxu_dtype, act_dtype)
    scale3, shift3 = _fold_bn(params["bn3_gamma"], params["bn3_beta"], s3, q3, M2)

    # ---- stage 3: out = relu(bn3(out2)) @ conv3_w + shortcut   (fully fused) ----
    w3 = params["conv3_w"].astype(mxu_dtype)
    if stride != 1 or Cin != Cout:
        # Projection shortcut: its bn1+relu+1x1 conv runs inside the same kernel.
        # TODO(synk): express the strided pixel gather with an index_map over the NHWC
        #             view instead of this (small) XLA strided-slice copy.
        xs2d = x_nhwc[:, ::stride, ::stride, :].reshape(M2, Cin)
        ws = params["sc_w"].astype(mxu_dtype)
        out = bn_relu_mm_add_proj(out2, scale3, shift3, w3,
                                  xs2d, scale1, shift1, ws, mxu_dtype)
    else:
        assert Cin == Cout, "identity shortcut requires in_planes == expansion*planes"
        out = bn_relu_mm_add_id(out2, scale3, shift3, w3, x2d, mxu_dtype)

    return out.reshape(N, Ho, Wo, Cout)


def init_params(key, in_planes, planes, stride, expansion=4):
    k1, k2, k3, k4 = jax.random.split(key, 4)
    out_planes = expansion * planes
    params = {
        # BatchNorm2d default init: weight = 1, bias = 0
        "bn1_gamma": jnp.ones((in_planes,), jnp.float32),
        "bn1_beta": jnp.zeros((in_planes,), jnp.float32),
        "bn2_gamma": jnp.ones((planes,), jnp.float32),
        "bn2_beta": jnp.zeros((planes,), jnp.float32),
        "bn3_gamma": jnp.ones((planes,), jnp.float32),
        "bn3_beta": jnp.zeros((planes,), jnp.float32),
        # conv weights (bias=False), stored channel-last (HWIO)
        "conv1_w": jax.random.normal(k1, (in_planes, planes), jnp.float32) * 0.1,
        "conv2_w": jax.random.normal(k2, (3, 3, planes, planes), jnp.float32) * 0.1,
        "conv3_w": jax.random.normal(k3, (planes, out_planes), jnp.float32) * 0.1,
    }
    if stride != 1 or in_planes != out_planes:
        params["sc_w"] = jax.random.normal(k4, (in_planes, out_planes), jnp.float32) * 0.1
    return params


def ref_forward(x_nhwc, params, stride):
    """Pure-JAX reference (same math, lax.conv) for correctness checking."""
    def bn_relu_ref(x, g, b):
        mean = x.mean(axis=(0, 1, 2))
        var = x.var(axis=(0, 1, 2))
        return jnp.maximum((x - mean) * (g / jnp.sqrt(var + EPS)) + b, 0.0)

    def conv(x, w, s, pad):
        return lax.conv_general_dilated(
            x, w, window_strides=(s, s), padding=pad,
            dimension_numbers=("NHWC", "HWIO", "NHWC"))

    Cin = x_nhwc.shape[-1]
    Cout = params["conv3_w"].shape[-1]
    a1 = bn_relu_ref(x_nhwc, params["bn1_gamma"], params["bn1_beta"])
    if stride != 1 or Cin != Cout:
        sc = conv(a1, params["sc_w"][None, None], stride, "VALID")
    else:
        sc = x_nhwc
    o = conv(a1, params["conv1_w"][None, None], 1, "VALID")
    o = conv(bn_relu_ref(o, params["bn2_gamma"], params["bn2_beta"]),
             params["conv2_w"], stride, ((1, 1), (1, 1)))
    o = conv(bn_relu_ref(o, params["bn3_gamma"], params["bn3_beta"]),
             params["conv3_w"][None, None], 1, "VALID")
    return o + sc


if __name__ == "__main__":
    key = jax.random.PRNGKey(0)
    kx, kp, kx2 = jax.random.split(key, 3)

    # Config 1: projection shortcut.  PyTorch-equivalent NCHW input: (2, 8, 16, 16);
    # here NHWC (2, 16, 16, 8), in_planes=8, planes=4, stride=2.
    N, H, W = 2, 16, 16
    in_planes, planes, stride = 8, 4, 2
    x = jax.random.normal(kx, (N, H, W, in_planes), jnp.float32)
    params = init_params(kp, in_planes, planes, stride)

    out = jax.block_until_ready(preact_bottleneck_forward(x, params, stride))
    ref = ref_forward(x, params, stride)
    assert out.shape == ref.shape, (out.shape, ref.shape)
    err = float(jnp.max(jnp.abs(out - ref)))
    assert jnp.allclose(out, ref, rtol=1e-3, atol=1e-3), err

    # Same block with bf16 MXU operands and bf16-stored intermediate activations
    # (BN stats / elementwise math stay f32) -> loose low-precision check.
    out_bf = jax.block_until_ready(
        preact_bottleneck_forward(x, params, stride, mxu_dtype=jnp.bfloat16))
    err_bf = float(jnp.max(jnp.abs(out_bf - ref)))
    assert jnp.allclose(out_bf, ref, rtol=1e-1, atol=1e-1), err_bf

    # Config 2: identity shortcut (stride=1, in_planes == expansion*planes).
    N2, H2, W2 = 2, 8, 8
    in2, planes2, stride2 = 16, 4, 1
    x2 = jax.random.normal(kx2, (N2, H2, W2, in2), jnp.float32)
    params2 = init_params(kp, in2, planes2, stride2)
    out2 = jax.block_until_ready(preact_bottleneck_forward(x2, params2, stride2))
    ref2 = ref_forward(x2, params2, stride2)
    assert out2.shape == ref2.shape, (out2.shape, ref2.shape)
    err2 = float(jnp.max(jnp.abs(out2 - ref2)))
    assert jnp.allclose(out2, ref2, rtol=1e-3, atol=1e-3), err2

    print("KERNEL_OK")
</pallas_src>

<mosaic_0001>
module attributes {stable_mosaic.version = 11 : i64} {
  func.func @_bn_stats_kernel(%arg0: i32, %arg1: memref<512x8xf32, #tpu.memory_space<vmem>>, %arg2: memref<1x8xf32, #tpu.memory_space<vmem>>, %arg3: memref<1x8xf32, #tpu.memory_space<vmem>>) attributes {dimension_semantics = [#tpu.dimension_semantics<arbitrary>], iteration_bounds = array<i64: 1>, scalar_prefetch = 0 : i64, scratch_operands = 0 : i64, tpu.core_type = #tpu.core_type<tc>, window_params = [{transform_indices = @transform_0, window_bounds = array<i64: 512, 8>}, {pipeline_mode = #tpu.pipeline_mode<synchronous>, transform_indices = @transform_1, window_bounds = array<i64: 1, 8>}, {pipeline_mode = #tpu.pipeline_mode<synchronous>, transform_indices = @transform_2, window_bounds = array<i64: 1, 8>}]} {
    %c0_i32 = arith.constant 0 : i32
    %0 = arith.cmpi eq, %arg0, %c0_i32 : i32
    %1 = arith.extui %0 : i1 to i32
    %c0_i32_0 = arith.constant 0 : i32
    %2 = arith.cmpi ne, %1, %c0_i32_0 : i32
    scf.if %2 {
      %cst_11 = arith.constant 0.000000e+00 : f32
      %15 = vector.broadcast %cst_11 : f32 to vector<1x8xf32>
      %c0_12 = arith.constant 0 : index
      %c0_13 = arith.constant 0 : index
      %16 = vector.load %arg2[%c0_12, %c0_13] : memref<1x8xf32, #tpu.memory_space<vmem>>, vector<1x8xf32>
      tpu.vector_store %arg2[%c0_12, %c0_13], %15 {strides = array<i32>} : memref<1x8xf32, #tpu.memory_space<vmem>>, vector<1x8xf32>,
      %cst_14 = arith.constant 0.000000e+00 : f32
      %17 = vector.broadcast %cst_14 : f32 to vector<1x8xf32>
      %c0_15 = arith.constant 0 : index
      %c0_16 = arith.constant 0 : index
      %18 = vector.load %arg3[%c0_15, %c0_16] : memref<1x8xf32, #tpu.memory_space<vmem>>, vector<1x8xf32>
      tpu.vector_store %arg3[%c0_15, %c0_16], %17 {strides = array<i32>} : memref<1x8xf32, #tpu.memory_space<vmem>>, vector<1x8xf32>,
    } else {
    }
    %c0 = arith.constant 0 : index
    %c0_1 = arith.constant 0 : index
    %3 = vector.load %arg1[%c0, %c0_1] : memref<512x8xf32, #tpu.memory_space<vmem>>, vector<512x8xf32>
    %c0_2 = arith.constant 0 : index
    %c0_3 = arith.constant 0 : index
    %4 = vector.load %arg2[%c0_2, %c0_3] : memref<1x8xf32, #tpu.memory_space<vmem>>, vector<1x8xf32>
    %cst = arith.constant dense<0.000000e+00> : vector<8xf32>
    %5 = vector.multi_reduction <add>, %3, %cst [0] : vector<512x8xf32> to vector<8xf32>
    %6 = vector.shape_cast %5 : vector<8xf32> to vector<1x8xf32>
    %7 = arith.addf %4, %6 : vector<1x8xf32>
    %c0_4 = arith.constant 0 : index
    %c0_5 = arith.constant 0 : index
    %8 = vector.load %arg2[%c0_4, %c0_5] : memref<1x8xf32, #tpu.memory_space<vmem>>, vector<1x8xf32>
    tpu.vector_store %arg2[%c0_4, %c0_5], %7 {strides = array<i32>} : memref<1x8xf32, #tpu.memory_space<vmem>>, vector<1x8xf32>,
    %c0_6 = arith.constant 0 : index
    %c0_7 = arith.constant 0 : index
    %9 = vector.load %arg3[%c0_6, %c0_7] : memref<1x8xf32, #tpu.memory_space<vmem>>, vector<1x8xf32>
    %10 = arith.mulf %3, %3 : vector<512x8xf32>
    %cst_8 = arith.constant dense<0.000000e+00> : vector<8xf32>
    %11 = vector.multi_reduction <add>, %10, %cst_8 [0] : vector<512x8xf32> to vector<8xf32>
    %12 = vector.shape_cast %11 : vector<8xf32> to vector<1x8xf32>
    %13 = arith.addf %9, %12 : vector<1x8xf32>
    %c0_9 = arith.constant 0 : index
    %c0_10 = arith.constant 0 : index
    %14 = vector.load %arg3[%c0_9, %c0_10] : memref<1x8xf32, #tpu.memory_space<vmem>>, vector<1x8xf32>
    tpu.vector_store %arg3[%c0_9, %c0_10], %13 {strides = array<i32>} : memref<1x8xf32, #tpu.memory_space<vmem>>, vector<1x8xf32>,
    return
  }
  func.func @transform_0(%arg0: i32) -> (i32, i32) {
    %c0_i32 = arith.constant 0 : i32
    %c0_i32_0 = arith.constant 0 : i32
    return %arg0, %c0_i32 : i32, i32
  }
  func.func @transform_1(%arg0: i32) -> (i32, i32) {
    %c0_i32 = arith.constant 0 : i32
    %c0_i32_0 = arith.constant 0 : i32
    %c0_i32_1 = arith.constant 0 : i32
    return %c0_i32, %c0_i32_0 : i32, i32
  }
  func.func @transform_2(%arg0: i32) -> (i32, i32) {
    %c0_i32 = arith.constant 0 : i32
    %c0_i32_0 = arith.constant 0 : i32
    %c0_i32_1 = arith.constant 0 : i32
    return %c0_i32, %c0_i32_0 : i32, i32
  }
}

</mosaic_0001>

<bundles_post_ra>
// kernel: tpu_custom_call.1
= control target key start
LH: loop header
LB: loop body
LE: loop exit
PB: predicated region body
PF: predicated region fallthrough
CT: control target
= control target key end

     0   :  { %8 = vsyncpa [#allocation3], 0  ;;  %s1156_s0 = inlined_call_operand.vmem [shape: f32[512,8], index: 0, kind: input, shape index: {}]   ;;  %s1157_s1 = inlined_call_operand.hbm [shape: f32[1,8], index: 1, kind: output, shape index: {0}]   ;;  %s1158_s2 = inlined_call_operand.hbm [shape: f32[1,8], index: 2, kind: output, shape index: {1}]  }
   0x1   :  { %9 = vsyncpa [#allocation5], 0  ;;  %vm16_vm0 = vcmask 57344   ;;  %v500_v0 = vmov 0.0   ;;  %v19_v1 = vld [vmem:[%s1156_s0] sm:$0xff]  ;;  %v20_v2 = vld [vmem:[%s1156_s0 + $0x8] sm:$0xff] }
   0x2   :  { %17 = vst.msk [vmem:[#allocation2] sm:$0x1] %vm16_vm0, %v500_v0  ;;  %18 = vst.msk [vmem:[#allocation4] sm:$0x1] %vm16_vm0, %v500_v0  ;;  %v21_v3 = vld [vmem:[%s1156_s0 + $0x10] sm:$0xff]  ;;  %vm84_vm1 = vcmask 64512   ;;  %v222_v55 = vmul.f32 %v19_v1, %v19_v1  ;;  %v223_v56 = vmul.f32 %v20_v2, %v20_v2 }
   0x3   :  { %v85_v4 = vsel %vm84_vm1, %v19_v1, 0.0  ;;  %v86_v5 = vsel %vm84_vm1, %v20_v2, 0.0  ;;  %v88_v6 = vsel %vm84_vm1, %v21_v3, 0.0  ;;  %v22_v7 = vld [vmem:[%s1156_s0 + $0x18] sm:$0xff]  ;;  %v23_v10 = vld [vmem:[%s1156_s0 + $0x20] sm:$0xff]  ;;  %v24_v13 = vld [vmem:[%s1156_s0 + $0x28] sm:$0xff]  ;;  %v224_v57 = vmul.f32 %v21_v3, %v21_v3 }
   0x4   :  { %v87_v8 = vadd.f32 %v86_v5, %v85_v4  ;;  %v90_v9 = vsel %vm84_vm1, %v22_v7, 0.0  ;;  %v92_v12 = vsel %vm84_vm1, %v23_v10, 0.0  ;;  %v94_v15 = vsel %vm84_vm1, %v24_v13, 0.0  ;;  %v547_v16 = vld [vmem:[%s1156_s0 + $0x30] sm:$0xff]  ;;  %v554_v19 = vld [vmem:[%s1156_s0 + $0x38] sm:$0xff]  ;;  %v561_v22 = vld [vmem:[%s1156_s0 + $0x40] sm:$0xff] }
   0x5   :  { %v96_v18 = vsel %vm84_vm1, %v547_v16, 0.0  ;;  %v98_v21 = vsel %vm84_vm1, %v554_v19, 0.0  ;;  %v100_v24 = vsel %vm84_vm1, %v561_v22, 0.0  ;;  %v568_v25 = vld [vmem:[%s1156_s0 + $0x48] sm:$0xff]  ;;  %v575_v28 = vld [vmem:[%s1156_s0 + $0x50] sm:$0xff]  ;;  %v582_v31 = vld [vmem:[%s1156_s0 + $0x58] sm:$0xff]  ;;  %v225_v61 = vmul.f32 %v22_v7, %v22_v7 }
   0x6   :  { %v89_v11 = vadd.f32 %v88_v6, %v87_v8  ;;  %v102_v27 = vsel %vm84_vm1, %v568_v25, 0.0  ;;  %v104_v30 = vsel %vm84_vm1, %v575_v28, 0.0  ;;  %v106_v33 = vsel %vm84_vm1, %v582_v31, 0.0  ;;  %v589_v34 = vld [vmem:[%s1156_s0 + $0x60] sm:$0xff]  ;;  %v596_v37 = vld [vmem:[%s1156_s0 + $0x68] sm:$0xff]  ;;  %v603_v40 = vld [vmem:[%s1156_s0 + $0x70] sm:$0xff] }
   0x7   :  { %v108_v36 = vsel %vm84_vm1, %v589_v34, 0.0  ;;  %v110_v39 = vsel %vm84_vm1, %v596_v37, 0.0  ;;  %v112_v42 = vsel %vm84_vm1, %v603_v40, 0.0  ;;  %v610_v43 = vld [vmem:[%s1156_s0 + $0x78] sm:$0xff]  ;;  %v617_v46 = vld [vmem:[%s1156_s0 + $0x80] sm:$0xff]  ;;  %v624_v49 = vld [vmem:[%s1156_s0 + $0x88] sm:$0xff]  ;;  %v226_v0 = vmul.f32 %v23_v10, %v23_v10 }
   0x8   :  { %v91_v14 = vadd.f32 %v90_v9, %v89_v11  ;;  %v114_v45 = vsel %vm84_vm1, %v610_v43, 0.0  ;;  %v116_v48 = vsel %vm84_vm1, %v617_v46, 0.0  ;;  %v118_v51 = vsel %vm84_vm1, %v624_v49, 0.0  ;;  %v631_v52 = vld [vmem:[%s1156_s0 + $0x90] sm:$0xff]  ;;  %v638_v58 = vld [vmem:[%s1156_s0 + $0x98] sm:$0xff]  ;;  %v645_v62 = vld [vmem:[%s1156_s0 + $0xa0] sm:$0xff] }
   0x9   :  { %v120_v54 = vsel %vm84_vm1, %v631_v52, 0.0  ;;  %v122_v60 = vsel %vm84_vm1, %v638_v58, 0.0  ;;  %v124_v1 = vsel %vm84_vm1, %v645_v62, 0.0  ;;  %v286_v2 = vsel %vm84_vm1, %v222_v55, 0.0  ;;  %v655_v5 = vld [vmem:[%s1156_s0 + $0xa8] sm:$0xff]  ;;  %v663_v11 = vld [vmem:[%s1156_s0 + $0xb0] sm:$0xff] }
   0xa   :  { %v93_v17 = vadd.f32 %v92_v12, %v91_v14  ;;  %v287_v3 = vsel %vm84_vm1, %v223_v56, 0.0  ;;  %v289_v4 = vsel %vm84_vm1, %v224_v57, 0.0  ;;  %v126_v8 = vsel %vm84_vm1, %v655_v5, 0.0 }
   0xb   :  { %v288_v7 = vadd.f32 %v287_v3, %v286_v2  ;;  %v227_v9 = vmul.f32 %v24_v13, %v24_v13  ;;  %v291_v10 = vsel %vm84_vm1, %v225_v61, 0.0  ;;  %v673_v13 = vld [vmem:[%s1156_s0 + $0xb8] sm:$0xff]  ;;  %v235_v2 = vmul.f32 %v596_v37, %v596_v37 }
   0xc   :  { %v95_v20 = vadd.f32 %v94_v15, %v93_v17  ;;  %v128_v15 = vsel %vm84_vm1, %v663_v11, 0.0  ;;  %v228_v17 = vmul.f32 %v547_v16, %v547_v16  ;;  %v683_v16 = vld [vmem:[%s1156_s0 + $0xc0] sm:$0xff]  ;;  %v753_v37 = vld [vmem:[%s1156_s0 + $0xf8] sm:$0xff] }
   0xd   :  { %v290_v14 = vadd.f32 %v289_v4, %v288_v7 }
   0xe   :  { %v97_v23 = vadd.f32 %v96_v18, %v95_v20  ;;  %v293_v18 = vsel %vm84_vm1, %v226_v0, 0.0 }
  0x10   :  { %v99_v26 = vadd.f32 %v98_v21, %v97_v23  ;;  %v292_v21 = vadd.f32 %v291_v10, %v290_v14  ;;  %v130_v23 = vsel %vm84_vm1, %v673_v13, 0.0  ;;  %v146_v14 = vsel %vm84_vm1, %v753_v37, 0.0 }
  0x12   :  { %v101_v29 = vadd.f32 %v100_v24, %v99_v26  ;;  %v229_v24 = vmul.f32 %v554_v19, %v554_v19  ;;  %v295_v26 = vsel %vm84_vm1, %v227_v9, 0.0  ;;  %v693_v19 = vld [vmem:[%s1156_s0 + $0xc8] sm:$0xff] }
  0x14   :  { %v103_v32 = vadd.f32 %v102_v27, %v101_v29  ;;  %v294_v29 = vadd.f32 %v293_v18, %v292_v21 }
  0x16   :  { %v105_v35 = vadd.f32 %v104_v30, %v103_v32  ;;  %v132_v30 = vsel %vm84_vm1, %v683_v16, 0.0  ;;  %v230_v32 = vmul.f32 %v561_v22, %v561_v22  ;;  %v703_v22 = vld [vmem:[%s1156_s0 + $0xd0] sm:$0xff] }
  0x18   :  { %v107_v38 = vadd.f32 %v106_v33, %v105_v35  ;;  %v297_v33 = vsel %vm84_vm1, %v228_v17, 0.0  ;;  %v311_v17 = vsel %vm84_vm1, %v235_v2, 0.0 }
  0x1a   :  { %v109_v41 = vadd.f32 %v108_v36, %v107_v38  ;;  %v296_v36 = vadd.f32 %v295_v26, %v294_v29  ;;  %v134_v38 = vsel %vm84_vm1, %v693_v19, 0.0 }
  0x1c   :  { %v111_v44 = vadd.f32 %v110_v39, %v109_v41  ;;  %v231_v39 = vmul.f32 %v568_v25, %v568_v25  ;;  %v299_v41 = vsel %vm84_vm1, %v229_v24, 0.0  ;;  %v713_v25 = vld [vmem:[%s1156_s0 + $0xd8] sm:$0xff] }
  0x1e   :  { %v113_v47 = vadd.f32 %v112_v42, %v111_v44  ;;  %v298_v44 = vadd.f32 %v297_v33, %v296_v36  ;;  %v303_v55 = vsel %vm84_vm1, %v231_v39, 0.0 }
  0x20   :  { %v115_v50 = vadd.f32 %v114_v45, %v113_v47  ;;  %v136_v45 = vsel %vm84_vm1, %v703_v22, 0.0  ;;  %v232_v47 = vmul.f32 %v575_v28, %v575_v28  ;;  %v723_v28 = vld [vmem:[%s1156_s0 + $0xe0] sm:$0xff] }
  0x22   :  { %v117_v53 = vadd.f32 %v116_v48, %v115_v50  ;;  %v301_v48 = vsel %vm84_vm1, %v230_v32, 0.0  ;;  %v305_v61 = vsel %vm84_vm1, %v232_v47, 0.0 }
  0x24   :  { %v119_v59 = vadd.f32 %v118_v51, %v117_v53  ;;  %v300_v51 = vadd.f32 %v299_v41, %v298_v44  ;;  %v138_v53 = vsel %vm84_vm1, %v713_v25, 0.0 }
  0x26   :  { %v121_v63 = vadd.f32 %v120_v54, %v119_v59  ;;  %v233_v54 = vmul.f32 %v582_v31, %v582_v31  ;;  %v302_v57 = vadd.f32 %v301_v48, %v300_v51  ;;  %v140_v59 = vsel %vm84_vm1, %v723_v28, 0.0  ;;  %v733_v31 = vld [vmem:[%s1156_s0 + $0xe8] sm:$0xff] }
  0x28   :  { %v123_v6 = vadd.f32 %v122_v60, %v121_v63  ;;  %v234_v60 = vmul.f32 %v589_v34, %v589_v34  ;;  %v304_v0 = vadd.f32 %v303_v55, %v302_v57  ;;  %v307_v3 = vsel %vm84_vm1, %v233_v54, 0.0  ;;  %v743_v34 = vld [vmem:[%s1156_s0 + $0xf0] sm:$0xff] }
  0x29   :  { %v144_v7 = vsel %vm84_vm1, %v743_v34, 0.0 }
  0x2a   :  { %v125_v12 = vadd.f32 %v124_v1, %v123_v6  ;;  %v142_v1 = vsel %vm84_vm1, %v733_v31, 0.0  ;;  %v306_v6 = vadd.f32 %v305_v61, %v304_v0  ;;  %v309_v9 = vsel %vm84_vm1, %v234_v60, 0.0 }
  0x2c   :  { %v127_v20 = vadd.f32 %v126_v8, %v125_v12  ;;  %v236_v8 = vmul.f32 %v603_v40, %v603_v40  ;;  %v308_v12 = vadd.f32 %v307_v3, %v306_v6  ;;  %v763_v40 = vld [vmem:[%s1156_s0 + $0x100] sm:$0xff] }
  0x2d   :  { %v148_v21 = vsel %vm84_vm1, %v763_v40, 0.0 }
  0x2e   :  { %v129_v27 = vadd.f32 %v128_v15, %v127_v20  ;;  %v237_v15 = vmul.f32 %v610_v43, %v610_v43  ;;  %v310_v20 = vadd.f32 %v309_v9, %v308_v12  ;;  %v313_v24 = vsel %vm84_vm1, %v236_v8, 0.0  ;;  %v773_v43 = vld [vmem:[%s1156_s0 + $0x108] sm:$0xff] }
  0x2f   :  { %v150_v29 = vsel %vm84_vm1, %v773_v43, 0.0 }
  0x30   :  { %v131_v35 = vadd.f32 %v130_v23, %v129_v27  ;;  %v238_v23 = vmul.f32 %v617_v46, %v617_v46  ;;  %v312_v27 = vadd.f32 %v311_v17, %v310_v20  ;;  %v315_v32 = vsel %vm84_vm1, %v237_v15, 0.0  ;;  %v783_v46 = vld [vmem:[%s1156_s0 + $0x110] sm:$0xff] }
  0x31   :  { %v152_v36 = vsel %vm84_vm1, %v783_v46, 0.0 }
  0x32   :  { %v133_v42 = vadd.f32 %v132_v30, %v131_v35  ;;  %v239_v30 = vmul.f32 %v624_v49, %v624_v49  ;;  %v314_v35 = vadd.f32 %v313_v24, %v312_v27  ;;  %v317_v39 = vsel %vm84_vm1, %v238_v23, 0.0  ;;  %v793_v49 = vld [vmem:[%s1156_s0 + $0x118] sm:$0xff] }
  0x33   :  { %v154_v44 = vsel %vm84_vm1, %v793_v49, 0.0 }
  0x34   :  { %v135_v50 = vadd.f32 %v134_v38, %v133_v42  ;;  %v240_v38 = vmul.f32 %v631_v52, %v631_v52  ;;  %v316_v42 = vadd.f32 %v315_v32, %v314_v35  ;;  %v319_v47 = vsel %vm84_vm1, %v239_v30, 0.0  ;;  %v803_v52 = vld [vmem:[%s1156_s0 + $0x120] sm:$0xff] }
  0x35   :  { %v156_v51 = vsel %vm84_vm1, %v803_v52, 0.0 }
  0x36   :  { %v137_v56 = vadd.f32 %v136_v45, %v135_v50  ;;  %v241_v45 = vmul.f32 %v638_v58, %v638_v58  ;;  %v318_v50 = vadd.f32 %v317_v39, %v316_v42  ;;  %v321_v54 = vsel %vm84_vm1, %v240_v38, 0.0  ;;  %v813_v58 = vld [vmem:[%s1156_s0 + $0x128] sm:$0xff] }
  0x37   :  { %v158_v57 = vsel %vm84_vm1, %v813_v58, 0.0 }
  0x38   :  { %v139_v63 = vadd.f32 %v138_v53, %v137_v56  ;;  %v242_v53 = vmul.f32 %v645_v62, %v645_v62  ;;  %v320_v56 = vadd.f32 %v319_v47, %v318_v50  ;;  %v323_v60 = vsel %vm84_vm1, %v241_v45, 0.0  ;;  %v823_v62 = vld [vmem:[%s1156_s0 + $0x130] sm:$0xff] }
  0x39   :  { %v160_v0 = vsel %vm84_vm1, %v823_v62, 0.0 }
  0x3a   :  { %v141_v4 = vadd.f32 %v140_v59, %v139_v63  ;;  %v243_v59 = vmul.f32 %v655_v5, %v655_v5  ;;  %v322_v63 = vadd.f32 %v321_v54, %v320_v56  ;;  %v325_v2 = vsel %vm84_vm1, %v242_v53, 0.0  ;;  %v833_v5 = vld [vmem:[%s1156_s0 + $0x138] sm:$0xff] }
  0x3b   :  { %v162_v6 = vsel %vm84_vm1, %v833_v5, 0.0 }
  0x3c   :  { %v143_v10 = vadd.f32 %v142_v1, %v141_v4  ;;  %v244_v1 = vmul.f32 %v663_v11, %v663_v11  ;;  %v324_v4 = vadd.f32 %v323_v60, %v322_v63  ;;  %v327_v8 = vsel %vm84_vm1, %v243_v59, 0.0  ;;  %v843_v11 = vld [vmem:[%s1156_s0 + $0x140] sm:$0xff] }
  0x3d   :  { %v164_v12 = vsel %vm84_vm1, %v843_v11, 0.0 }
  0x3e   :  { %v145_v18 = vadd.f32 %v144_v7, %v143_v10  ;;  %v245_v7 = vmul.f32 %v673_v13, %v673_v13  ;;  %v326_v10 = vadd.f32 %v325_v2, %v324_v4  ;;  %v329_v15 = vsel %vm84_vm1, %v244_v1, 0.0  ;;  %v853_v13 = vld [vmem:[%s1156_s0 + $0x148] sm:$0xff] }
  0x3f   :  { %v166_v20 = vsel %vm84_vm1, %v853_v13, 0.0 }
  0x40   :  { %v147_v26 = vadd.f32 %v146_v14, %v145_v18  ;;  %v246_v14 = vmul.f32 %v683_v16, %v683_v16  ;;  %v328_v18 = vadd.f32 %v327_v8, %v326_v10  ;;  %v331_v23 = vsel %vm84_vm1, %v245_v7, 0.0  ;;  %v863_v16 = vld [vmem:[%s1156_s0 + $0x150] sm:$0xff] }
  0x41   :  { %v168_v27 = vsel %vm84_vm1, %v863_v16, 0.0 }
  0x42   :  { %v149_v33 = vadd.f32 %v148_v21, %v147_v26  ;;  %v247_v21 = vmul.f32 %v693_v19, %v693_v19  ;;  %v330_v26 = vadd.f32 %v329_v15, %v328_v18  ;;  %v333_v30 = vsel %vm84_vm1, %v246_v14, 0.0  ;;  %v873_v19 = vld [vmem:[%s1156_s0 + $0x158] sm:$0xff] }
  0x43   :  { %v170_v35 = vsel %vm84_vm1, %v873_v19, 0.0 }
  0x44   :  { %v151_v41 = vadd.f32 %v150_v29, %v149_v33  ;;  %v248_v29 = vmul.f32 %v703_v22, %v703_v22  ;;  %v332_v33 = vadd.f32 %v331_v23, %v330_v26  ;;  %v335_v38 = vsel %vm84_vm1, %v247_v21, 0.0  ;;  %v883_v22 = vld [vmem:[%s1156_s0 + $0x160] sm:$0xff] }
  0x45   :  { %v172_v42 = vsel %vm84_vm1, %v883_v22, 0.0 }
  0x46   :  { %v153_v48 = vadd.f32 %v152_v36, %v151_v41  ;;  %v249_v36 = vmul.f32 %v713_v25, %v713_v25  ;;  %v334_v41 = vadd.f32 %v333_v30, %v332_v33  ;;  %v337_v45 = vsel %vm84_vm1, %v248_v29, 0.0  ;;  %v893_v25 = vld [vmem:[%s1156_s0 + $0x168] sm:$0xff] }
  0x47   :  { %v174_v50 = vsel %vm84_vm1, %v893_v25, 0.0 }
  0x48   :  { %v155_v55 = vadd.f32 %v154_v44, %v153_v48  ;;  %v250_v44 = vmul.f32 %v723_v28, %v723_v28  ;;  %v336_v48 = vadd.f32 %v335_v38, %v334_v41  ;;  %v339_v53 = vsel %vm84_vm1, %v249_v36, 0.0  ;;  %v903_v28 = vld [vmem:[%s1156_s0 + $0x170] sm:$0xff] }
  0x49   :  { %v176_v56 = vsel %vm84_vm1, %v903_v28, 0.0 }
  0x4a   :  { %v157_v61 = vadd.f32 %v156_v51, %v155_v55  ;;  %v251_v51 = vmul.f32 %v733_v31, %v733_v31  ;;  %v338_v55 = vadd.f32 %v337_v45, %v336_v48  ;;  %v341_v59 = vsel %vm84_vm1, %v250_v44, 0.0  ;;  %v913_v31 = vld [vmem:[%s1156_s0 + $0x178] sm:$0xff] }
  0x4b   :  { %v178_v63 = vsel %vm84_vm1, %v913_v31, 0.0 }
  0x4c   :  { %v159_v3 = vadd.f32 %v158_v57, %v157_v61  ;;  %v252_v57 = vmul.f32 %v743_v34, %v743_v34  ;;  %v340_v61 = vadd.f32 %v339_v53, %v338_v55  ;;  %v343_v1 = vsel %vm84_vm1, %v251_v51, 0.0  ;;  %v923_v34 = vld [vmem:[%s1156_s0 + $0x180] sm:$0xff] }
  0x4d   :  { %v180_v4 = vsel %vm84_vm1, %v923_v34, 0.0 }
  0x4e   :  { %v161_v9 = vadd.f32 %v160_v0, %v159_v3  ;;  %v253_v0 = vmul.f32 %v753_v37, %v753_v37  ;;  %v342_v3 = vadd.f32 %v341_v59, %v340_v61  ;;  %v345_v7 = vsel %vm84_vm1, %v252_v57, 0.0  ;;  %v933_v37 = vld [vmem:[%s1156_s0 + $0x188] sm:$0xff] }
  0x4f   :  { %v182_v10 = vsel %vm84_vm1, %v933_v37, 0.0 }
  0x50   :  { %v163_v17 = vadd.f32 %v162_v6, %v161_v9  ;;  %v254_v6 = vmul.f32 %v763_v40, %v763_v40  ;;  %v344_v9 = vadd.f32 %v343_v1, %v342_v3  ;;  %v347_v14 = vsel %vm84_vm1, %v253_v0, 0.0  ;;  %v943_v40 = vld [vmem:[%s1156_s0 + $0x190] sm:$0xff] }
  0x51   :  { %v184_v18 = vsel %vm84_vm1, %v943_v40, 0.0 }
  0x52   :  { %v165_v24 = vadd.f32 %v164_v12, %v163_v17  ;;  %v255_v12 = vmul.f32 %v773_v43, %v773_v43  ;;  %v346_v17 = vadd.f32 %v345_v7, %v344_v9  ;;  %v349_v21 = vsel %vm84_vm1, %v254_v6, 0.0  ;;  %v953_v43 = vld [vmem:[%s1156_s0 + $0x198] sm:$0xff] }
  0x53   :  { %v186_v26 = vsel %vm84_vm1, %v953_v43, 0.0 }
  0x54   :  { %v167_v32 = vadd.f32 %v166_v20, %v165_v24  ;;  %v256_v20 = vmul.f32 %v783_v46, %v783_v46  ;;  %v348_v24 = vadd.f32 %v347_v14, %v346_v17  ;;  %v351_v29 = vsel %vm84_vm1, %v255_v12, 0.0  ;;  %v963_v46 = vld [vmem:[%s1156_s0 + $0x1a0] sm:$0xff] }
  0x55   :  { %v188_v33 = vsel %vm84_vm1, %v963_v46, 0.0 }
  0x56   :  { %v169_v39 = vadd.f32 %v168_v27, %v167_v32  ;;  %v257_v27 = vmul.f32 %v793_v49, %v793_v49  ;;  %v350_v32 = vadd.f32 %v349_v21, %v348_v24  ;;  %v353_v36 = vsel %vm84_vm1, %v256_v20, 0.0  ;;  %v973_v49 = vld [vmem:[%s1156_s0 + $0x1a8] sm:$0xff] }
  0x57   :  { %v190_v41 = vsel %vm84_vm1, %v973_v49, 0.0 }
  0x58   :  { %v171_v47 = vadd.f32 %v170_v35, %v169_v39  ;;  %v258_v35 = vmul.f32 %v803_v52, %v803_v52  ;;  %v352_v39 = vadd.f32 %v351_v29, %v350_v32  ;;  %v355_v44 = vsel %vm84_vm1, %v257_v27, 0.0  ;;  %v983_v52 = vld [vmem:[%s1156_s0 + $0x1b0] sm:$0xff] }
  0x59   :  { %v192_v48 = vsel %vm84_vm1, %v983_v52, 0.0 }
  0x5a   :  { %v173_v54 = vadd.f32 %v172_v42, %v171_v47  ;;  %v259_v42 = vmul.f32 %v813_v58, %v813_v58  ;;  %v354_v47 = vadd.f32 %v353_v36, %v352_v39  ;;  %v357_v51 = vsel %vm84_vm1, %v258_v35, 0.0  ;;  %v993_v58 = vld [vmem:[%s1156_s0 + $0x1b8] sm:$0xff] }
  0x5b   :  { %v194_v55 = vsel %vm84_vm1, %v993_v58, 0.0 }
  0x5c   :  { %v175_v60 = vadd.f32 %v174_v50, %v173_v54  ;;  %v260_v50 = vmul.f32 %v823_v62, %v823_v62  ;;  %v356_v54 = vadd.f32 %v355_v44, %v354_v47  ;;  %v359_v57 = vsel %vm84_vm1, %v259_v42, 0.0  ;;  %v1003_v62 = vld [vmem:[%s1156_s0 + $0x1c0] sm:$0xff] }
  0x5d   :  { %v196_v61 = vsel %vm84_vm1, %v1003_v62, 0.0 }
  0x5e   :  { %v177_v2 = vadd.f32 %v176_v56, %v175_v60  ;;  %v261_v56 = vmul.f32 %v833_v5, %v833_v5  ;;  %v358_v60 = vadd.f32 %v357_v51, %v356_v54  ;;  %v361_v0 = vsel %vm84_vm1, %v260_v50, 0.0  ;;  %v1013_v5 = vld [vmem:[%s1156_s0 + $0x1c8] sm:$0xff] }
  0x5f   :  { %v198_v3 = vsel %vm84_vm1, %v1013_v5, 0.0 }
  0x60   :  { %v179_v8 = vadd.f32 %v178_v63, %v177_v2  ;;  %v262_v63 = vmul.f32 %v843_v11, %v843_v11  ;;  %v360_v2 = vadd.f32 %v359_v57, %v358_v60  ;;  %v363_v6 = vsel %vm84_vm1, %v261_v56, 0.0  ;;  %v1023_v11 = vld [vmem:[%s1156_s0 + $0x1d0] sm:$0xff] }
  0x61   :  { %v200_v9 = vsel %vm84_vm1, %v1023_v11, 0.0  ;;  %v271_v57 = vmul.f32 %v933_v37, %v933_v37  ;;  %v274_v37 = vmul.f32 %v963_v46, %v963_v46 }
  0x62   :  { %v181_v15 = vadd.f32 %v180_v4, %v179_v8  ;;  %v263_v4 = vmul.f32 %v853_v13, %v853_v13  ;;  %v362_v8 = vadd.f32 %v361_v0, %v360_v2  ;;  %v365_v12 = vsel %vm84_vm1, %v262_v63, 0.0  ;;  %v1033_v13 = vld [vmem:[%s1156_s0 + $0x1d8] sm:$0xff] }
  0x63   :  { %v202_v17 = vsel %vm84_vm1, %v1033_v13, 0.0  ;;  %v383_v2 = vsel %vm84_vm1, %v271_v57, 0.0 }
  0x64   :  { %v183_v23 = vadd.f32 %v182_v10, %v181_v15  ;;  %v264_v10 = vmul.f32 %v863_v16, %v863_v16  ;;  %v364_v15 = vadd.f32 %v363_v6, %v362_v8  ;;  %v367_v20 = vsel %vm84_vm1, %v263_v4, 0.0  ;;  %v1043_v16 = vld [vmem:[%s1156_s0 + $0x1e0] sm:$0xff] }
  0x65   :  { %v204_v24 = vsel %vm84_vm1, %v1043_v16, 0.0 }
  0x66   :  { %v185_v30 = vadd.f32 %v184_v18, %v183_v23  ;;  %v265_v18 = vmul.f32 %v873_v19, %v873_v19  ;;  %v366_v23 = vadd.f32 %v365_v12, %v364_v15  ;;  %v369_v27 = vsel %vm84_vm1, %v264_v10, 0.0  ;;  %v1053_v19 = vld [vmem:[%s1156_s0 + $0x1e8] sm:$0xff] }
  0x67   :  { %v206_v32 = vsel %vm84_vm1, %v1053_v19, 0.0  ;;  %v389_v15 = vsel %vm84_vm1, %v274_v37, 0.0 }
  0x68   :  { %v187_v38 = vadd.f32 %v186_v26, %v185_v30  ;;  %v266_v26 = vmul.f32 %v883_v22, %v883_v22  ;;  %v368_v30 = vadd.f32 %v367_v20, %v366_v23  ;;  %v371_v35 = vsel %vm84_vm1, %v265_v18, 0.0  ;;  %v1063_v22 = vld [vmem:[%s1156_s0 + $0x1f0] sm:$0xff] }
  0x69   :  { %v208_v39 = vsel %vm84_vm1, %v1063_v22, 0.0  ;;  %v277_v18 = vmul.f32 %v993_v58, %v993_v58  ;;  %v278_v23 = vmul.f32 %v1003_v62, %v1003_v62 }
  0x6a   :  { %v189_v45 = vadd.f32 %v188_v33, %v187_v38  ;;  %v267_v33 = vmul.f32 %v893_v25, %v893_v25  ;;  %v370_v38 = vadd.f32 %v369_v27, %v368_v30  ;;  %v373_v42 = vsel %vm84_vm1, %v266_v26, 0.0  ;;  %v1073_v25 = vld [vmem:[%s1156_s0 + $0x1f8] sm:$0xff]  ;;  %s501_s0 = smov [#allocation2]  }
  0x6b   :  { %v210_v47 = vsel %vm84_vm1, %v1073_v25, 0.0  ;;  %s427_s25 = sshll.u32 %s501_s0, 4  ;;  %v279_v26 = vmul.f32 %v1013_v5, %v1013_v5  ;;  %v395_v27 = vsel %vm84_vm1, %v277_v18, 0.0  ;;  %s428_s25 = int_to_ptr.vmem [resolvable:$true] %s427_s25 }
  0x6c   :  { %v191_v53 = vadd.f32 %v190_v41, %v189_v45  ;;  %v268_v41 = vmul.f32 %v903_v28, %v903_v28  ;;  %v372_v45 = vadd.f32 %v371_v35, %v370_v38  ;;  %v375_v50 = vsel %vm84_vm1, %v267_v33, 0.0  ;;  %s452_s26 = scalar_lea.vmem %s428_s25, 16  ;;  %s456_s27 = scalar_lea.vmem %s428_s25, 32 }
  0x6d   :  { %v270_v28 = vmul.f32 %v923_v34, %v923_v34  ;;  %v273_v34 = vmul.f32 %v953_v43, %v953_v43  ;;  %v276_v43 = vmul.f32 %v983_v52, %v983_v52  ;;  %p453_p0 = scmp.ne.s32.totalorder %s428_s25, %s452_s26  ;;  %p457_p1 = scmp.lt.s32.totalorder %s428_s25, %s428_s25 }
  0x6e   :  { %v193_v59 = vadd.f32 %v192_v48, %v191_v53  ;;  %v269_v48 = vmul.f32 %v913_v31, %v913_v31  ;;  %v374_v53 = vadd.f32 %v373_v42, %v372_v45  ;;  %v377_v54 = vsel %vm84_vm1, %v268_v41, 0.0  ;;  %p458_p2 = scmp.lt.s32.totalorder %s456_s27, %s452_s26 }
  0x6f   :  { %v272_v31 = vmul.f32 %v943_v40, %v943_v40  ;;  %v381_v63 = vsel %vm84_vm1, %v270_v28, 0.0  ;;  %v275_v40 = vmul.f32 %v973_v49, %v973_v49 }
  0x70   :  { %v195_v1 = vadd.f32 %v194_v55, %v193_v59  ;;  %v376_v56 = vadd.f32 %v375_v50, %v374_v53  ;;  %v379_v59 = vsel %vm84_vm1, %v269_v48, 0.0  ;;  %p459_p3 = por %p458_p2, %p457_p1 }
  0x71   :  { %v385_v6 = vsel %vm84_vm1, %v272_v31, 0.0  ;;  %v391_v20 = vsel %vm84_vm1, %v275_v40, 0.0 }
  0x72   :  { %v197_v7 = vadd.f32 %v196_v61, %v195_v1  ;;  %v378_v61 = vadd.f32 %v377_v54, %v376_v56  ;;  %p460_p4 = pnand %p459_p3, %p453_p0 }
  0x74   :  { %v199_v14 = vadd.f32 %v198_v3, %v197_v7  ;;  %v380_v1 = vadd.f32 %v379_v59, %v378_v61 }
  0x76   :  { %v201_v21 = vadd.f32 %v200_v9, %v199_v14  ;;  %v382_v4 = vadd.f32 %v381_v63, %v380_v1  ;;  %v387_v9 = vsel %vm84_vm1, %v273_v34, 0.0  ;;  %v83_v14 = vld [vmem:[#allocation2] sm:$0x1] }
  0x78   :  { %v203_v29 = vadd.f32 %v202_v17, %v201_v21  ;;  %v384_v8 = vadd.f32 %v383_v2, %v382_v4 }
  0x7a   :  { %v205_v36 = vadd.f32 %v204_v24, %v203_v29  ;;  %v386_v12 = vadd.f32 %v385_v6, %v384_v8  ;;  %v393_v24 = vsel %vm84_vm1, %v276_v43, 0.0 }
  0x7c   :  { %v207_v44 = vadd.f32 %v206_v32, %v205_v36  ;;  %v388_v17 = vadd.f32 %v387_v9, %v386_v12 }
  0x7e   :  { %v209_v51 = vadd.f32 %v208_v39, %v207_v44  ;;  %v390_v21 = vadd.f32 %v389_v15, %v388_v17 }
  0x80   :  { %v211_v55 = vadd.f32 %v210_v47, %v209_v51  ;;  %v392_v52 = vadd.f32 %v391_v20, %v390_v21 }
  0x82   :  { %v212_v60 = vrot.slane %v211_v55, 4 }
  0x84   :  { %v213_v0 = vadd.f32 %v212_v60, %v211_v55 }
  0x86   :  { %v214_v3 = vrot.slane %v213_v0, 2 }
  0x88   :  { %v215_v7 = vadd.f32 %v214_v3, %v213_v0 }
  0x8a   :  { %v216_v10 = vrot.slane %v215_v7, 1 }
  0x8c   :  { %v217_v46 = vadd.f32 %v216_v10, %v215_v7 }
  0x8e   :  { %v218_v49 = vadd.f32 %v217_v46, %v83_v14 }
  0x90   :  { %220 = vst.msk [vmem:[#allocation2] sm:$0x1] %vm16_vm0, %v218_v49 }
  0x91   :  { %463 = shalt.err (!%p460_p4)
}
  0x92   :  { %s464_s30 = scalar_lea.hbm %s1157_s1, 16 }
  0x93   :  { %p465_p5 = scmp.ne.s32.totalorder %s1157_s1, %s464_s30  ;;  %p468_p6 = scmp.lt.u32.totalorder %s464_s30, %s1157_s1 }
  0x95   :  { %p470_p7 = pnand %p468_p6, %p465_p5 }
  0x97   :  { %473 = shalt.err (!%p470_p7)
}
  0x98   :  { %430 = dma.vmem_to_hbm [thread:$0]  %s428_s25, 16, %s1157_s1, [#allocation3]   ;;  %v394_v58 = vadd.f32 %v393_v24, %v392_v52  ;;  %v280_v62 = vmul.f32 %v1023_v11, %v1023_v11  ;;  %v397_v5 = vsel %vm84_vm1, %v278_v23, 0.0  ;;  %v281_v30 = vmul.f32 %v1033_v13, %v1033_v13  ;;  %v221_v57 = vld [vmem:[#allocation4] sm:$0x1] }
  0x99   :  { %v399_v32 = vsel %vm84_vm1, %v279_v26, 0.0  ;;  %v282_v35 = vmul.f32 %v1043_v16, %v1043_v16  ;;  %v283_v39 = vmul.f32 %v1053_v19, %v1053_v19  ;;  %v284_v42 = vmul.f32 %v1063_v22, %v1063_v22  ;;  %s502_s1 = smov [#allocation4]  }
  0x9a   :  { %v396_v29 = vadd.f32 %v395_v27, %v394_v58  ;;  %v401_v36 = vsel %vm84_vm1, %v280_v62, 0.0  ;;  %v403_v11 = vsel %vm84_vm1, %v281_v30, 0.0  ;;  %v285_v45 = vmul.f32 %v1073_v25, %v1073_v25  ;;  %s437_s9 = sshll.u32 %s502_s1, 4  ;;  %s438_s9 = int_to_ptr.vmem [resolvable:$true] %s437_s9 }
  0x9b   :  { %v405_v13 = vsel %vm84_vm1, %v282_v35, 0.0  ;;  %v407_v16 = vsel %vm84_vm1, %v283_v39, 0.0  ;;  %v409_v48 = vsel %vm84_vm1, %v284_v42, 0.0  ;;  %s474_s10 = scalar_lea.vmem %s438_s9, 16  ;;  %s478_s11 = scalar_lea.vmem %s438_s9, 32 }
  0x9c   :  { %v398_v33 = vadd.f32 %v397_v5, %v396_v29  ;;  %v411_v19 = vsel %vm84_vm1, %v285_v45, 0.0  ;;  %p475_p8 = scmp.ne.s32.totalorder %s438_s9, %s474_s10  ;;  %p479_p9 = scmp.lt.s32.totalorder %s438_s9, %s438_s9 }
  0x9d   :  { %p480_p10 = scmp.lt.s32.totalorder %s478_s11, %s474_s10 }
  0x9e   :  { %v400_v38 = vadd.f32 %v399_v32, %v398_v33 }
  0x9f   :  { %p481_p11 = por %p480_p10, %p479_p9 }
  0xa0   :  { %v402_v41 = vadd.f32 %v401_v36, %v400_v38 }
  0xa1   :  { %p482_p12 = pnand %p481_p11, %p475_p8 }
  0xa2   :  { %v404_v44 = vadd.f32 %v403_v11, %v402_v41 }
  0xa4   :  { %v406_v47 = vadd.f32 %v405_v13, %v404_v44 }
  0xa6   :  { %v408_v50 = vadd.f32 %v407_v16, %v406_v47 }
  0xa8   :  { %v410_v51 = vadd.f32 %v409_v48, %v408_v50 }
  0xaa   :  { %v412_v53 = vadd.f32 %v411_v19, %v410_v51 }
  0xac   :  { %v413_v28 = vrot.slane %v412_v53, 4 }
  0xae   :  { %v414_v54 = vadd.f32 %v413_v28, %v412_v53 }
  0xb0   :  { %v415_v55 = vrot.slane %v414_v54, 2 }
  0xb2   :  { %v416_v22 = vadd.f32 %v415_v55, %v414_v54 }
  0xb4   :  { %v417_v56 = vrot.slane %v416_v22, 1 }
  0xb6   :  { %v418_v59 = vadd.f32 %v417_v56, %v416_v22 }
  0xb8   :  { %v419_v25 = vadd.f32 %v418_v59, %v221_v57 }
  0xba   :  { %420 = vst.msk [vmem:[#allocation4] sm:$0x1] %vm16_vm0, %v419_v25 }
  0xbb   :  { %485 = shalt.err (!%p482_p12)
}
  0xbc   :  { %s486_s14 = scalar_lea.hbm %s1158_s2, 16 }
  0xbd   :  { %p487_p13 = scmp.ne.s32.totalorder %s1158_s2, %s486_s14  ;;  %p490_p0 = scmp.lt.u32.totalorder %s486_s14, %s1158_s2 }
  0xbf   :  { %p492_p1 = pnand %p490_p0, %p487_p13 }
  0xc1   :  { %495 = shalt.err (!%p492_p1)
}
  0xc2   :  { %440 = dma.vmem_to_hbm [thread:$0]  %s438_s9, 16, %s1158_s2, [#allocation5]  }
  0xc3   :  { %496 = dma.done.wait [#allocation3], 16  }
  0xc4   :  { %497 = vsyncadd [#allocation3], 4294967280 }
  0xc5   :  { %498 = dma.done.wait [#allocation5], 16  }
  0xc6   :  { %499 = vsyncadd [#allocation5], 4294967280 }
  0xc7   :  { %447 = vsyncpa [#allocation3], 1 }
  0xc8   :  { %448 = vsyncpa [#allocation5], 1 }

</bundles_post_ra>
